<compile_context>
chip_gen: v7x
topology: tpu7x:2x2x1
jax: 0.10.0
libtpu: 0.0.40
codegen_flags: <defaults>
</compile_context>

<pallas_src>
import functools

import jax
import jax.numpy as jnp
from jax.experimental import pallas as pl
from jax.experimental.pallas import tpu as pltpu


def _round_up(x, m):
    return (x + m - 1) // m * m


def _fused_lenet_kernel(x_ref,
                        w1, b1, w2, b2, w3, b3,      # encoder
                        w4, b4, w5, b5, w6, b6,      # decoder
                        enc_ref, dec_ref):
    """One batch-block of the full encoder + decoder forward.

    x_ref   : (Bblk, Kin_p)      padded f32 input activations
    w*      : padded [Kp, Np]    bf16 weights (VMEM-resident, single-buffered)
    b*      : padded [1, Np]     f32 biases
    enc_ref : (Bblk, n_outputs)  exact-width encode output
    dec_ref : (Bblk, n_inputs)   exact-width decode output
    """

    def layer(h, w_ref, b_ref, relu):
        # bf16 operands -> MXU, f32 accumulation; bias + ReLU in f32 on VPU.
        acc = jnp.dot(h.astype(w_ref.dtype), w_ref[...],
                      preferred_element_type=jnp.float32)
        acc = acc + b_ref[...]                 # (1, N) broadcasts over batch
        return jnp.maximum(acc, 0.0) if relu else acc

    h = x_ref[...]
    h = layer(h, w1, b1, True)
    h = layer(h, w2, b2, True)
    e = layer(h, w3, b3, False)                # (Bblk, Np) -- pad cols are 0
    enc_ref[...] = e[:, :enc_ref.shape[-1]].astype(enc_ref.dtype)

    d = layer(e, w4, b4, True)
    d = layer(d, w5, b5, True)
    d = layer(d, w6, b6, False)
    dec_ref[...] = d[:, :dec_ref.shape[-1]].astype(dec_ref.dtype)


def init_lenet_params(key, n_inputs, n_outputs=2):
    """PyTorch nn.Linear-style init: U(-1/sqrt(fan_in), 1/sqrt(fan_in)).
    Weights stored as [in, out] (transpose of PyTorch's [out, in])."""
    dims_enc = [(n_inputs, 300), (300, 100), (100, n_outputs)]
    dims_dec = [(n_outputs, 100), (100, 300), (300, n_inputs)]
    params = {"encoder": [], "decoder": []}
    for name, dims in (("encoder", dims_enc), ("decoder", dims_dec)):
        for (fan_in, fan_out) in dims:
            key, kw, kb = jax.random.split(key, 3)
            bound = 1.0 / jnp.sqrt(jnp.float32(fan_in))
            w = jax.random.uniform(kw, (fan_in, fan_out), jnp.float32,
                                   minval=-bound, maxval=bound)
            b = jax.random.uniform(kb, (fan_out,), jnp.float32,
                                   minval=-bound, maxval=bound)
            params[name].append((w, b))
    return params


def pad_lenet_params(params, weight_dtype=jnp.bfloat16):
    """Zero-pad every weight/bias to 128-multiple feature dims ONCE.
    Weights are stored in bf16 (MXU-native on all generations); biases stay
    f32 so the VPU epilogue (bias + ReLU) runs in f32 everywhere (important
    for v5e, whose VALUs have no bf16 path).  Zero K-row / zero-bias padding
    guarantees padded output columns of every layer are exact zeros, so
    chained padded activations are exact."""
    flat = []
    for name in ("encoder", "decoder"):
        for (w, b) in params[name]:
            K, N = w.shape
            Kp, Np = _round_up(K, 128), _round_up(N, 128)
            w_p = jnp.zeros((Kp, Np), weight_dtype).at[:K, :N].set(
                w.astype(weight_dtype))
            b_p = jnp.zeros((1, Np), jnp.float32).at[0, :N].set(b)
            flat += [w_p, b_p]
    return tuple(flat)


def _choose_batch_blocking(B):
    """Pick (block_b, num_blocks) to (a) cap per-step VMEM, (b) minimize batch
    padding, and (c) give v7x's 2 TensorCores >=2 grid steps for mid/large B."""
    cap = 1024                       # fits comfortably in VMEM on every gen
    if B >= 256:
        min_blocks = 2               # let the parallel axis actually shard
    else:
        min_blocks = 1               # small batch: one block, no step overhead
    num_blocks = max(pl.cdiv(B, cap), min_blocks)
    block_b = _round_up(pl.cdiv(B, num_blocks), 8)
    return block_b, num_blocks


@functools.partial(jax.jit, static_argnames=("n_outputs",))
def lenet_300_100_forward(padded_params, x, n_outputs=2):
    """Fused forward. Returns (encode, decode), matching the PyTorch module."""
    B, n_inputs = x.shape
    kin_p = _round_up(n_inputs, 128)

    block_b, num_blocks = _choose_batch_blocking(B)
    bp = block_b * num_blocks
    grid = (num_blocks,)

    # Pad the input ONLY along dims that need it (and not at all when aligned)
    # -- avoids a full HBM round-trip over the input before the kernel.
    if bp == B and kin_p == n_inputs:
        x_p = x
    else:
        x_p = jnp.pad(x, ((0, bp - B), (0, kin_p - n_inputs)))

    # Weights/biases: full-block specs, same block for every grid step, and
    # single-buffered (constant index_map -> never re-fetched).
    resident_specs = [
        pl.BlockSpec(p.shape, lambda i: (0, 0), pipeline_mode=pl.Buffered(1))
        for p in padded_params
    ]

    # Outputs are emitted at EXACT feature widths (last block dim == full array
    # dim), so no padded writeback and no post-kernel column slices.
    enc_p, dec_p = pl.pallas_call(
        _fused_lenet_kernel,
        out_shape=(jax.ShapeDtypeStruct((bp, n_outputs), jnp.float32),
                   jax.ShapeDtypeStruct((bp, n_inputs), jnp.float32)),
        grid=grid,
        in_specs=[pl.BlockSpec((block_b, kin_p), lambda i: (i, 0))]
                 + resident_specs,
        out_specs=(pl.BlockSpec((block_b, n_outputs), lambda i: (i, 0)),
                   pl.BlockSpec((block_b, n_inputs), lambda i: (i, 0))),
        compiler_params=pltpu.CompilerParams(
            dimension_semantics=("parallel",),
            # ~0.5 MiB bf16 resident weights + <=1 MiB double-buffered input
            # blocks + small outputs; explicit cap keeps headroom on v5e's
            # 16 MiB scoped default and v7x's 64 MiB physical VMEM.
            vmem_limit_bytes=32 * 1024 * 1024,
        ),
    )(x_p, *padded_params)

    enc = enc_p if bp == B else enc_p[:B]
    dec = dec_p if bp == B else dec_p[:B]
    return enc, dec


if __name__ == "__main__":
    n_inputs = 64
    n_outputs = 2
    batch = 8

    key = jax.random.PRNGKey(0)
    key_params, key_x = jax.random.split(key)

    params = init_lenet_params(key_params, n_inputs, n_outputs)
    padded_params = pad_lenet_params(params)          # padded once, reused
    x = jax.random.normal(key_x, (batch, n_inputs), jnp.float32)

    encode, decode = lenet_300_100_forward(padded_params, x,
                                           n_outputs=n_outputs)
    jax.block_until_ready((encode, decode))

    assert encode.shape == (batch, n_outputs)
    assert decode.shape == (batch, n_inputs)

    # Reference with matching numerics: bf16 dot operands, f32 accumulation,
    # f32 bias + ReLU (same rounding the kernel performs).
    def ref_linear(h, w, b, relu):
        y = jnp.dot(h.astype(jnp.bfloat16), w.astype(jnp.bfloat16),
                    preferred_element_type=jnp.float32) + b
        return jnp.maximum(y, 0.0) if relu else y

    h = x
    for i, (w, b) in enumerate(params["encoder"]):
        h = ref_linear(h, w, b, relu=(i < 2))
    enc_ref = h
    d = enc_ref
    for i, (w, b) in enumerate(params["decoder"]):
        d = ref_linear(d, w, b, relu=(i < 2))
    dec_ref = d

    assert jnp.allclose(encode, enc_ref, atol=2e-3, rtol=2e-3)
    assert jnp.allclose(decode, dec_ref, atol=2e-3, rtol=2e-3)

    print("KERNEL_OK")
</pallas_src>

<mosaic_0001>
module attributes {stable_mosaic.version = 11 : i64} {
  func.func @_fused_lenet_kernel(%arg0: i32, %arg1: memref<8x128xf32, #tpu.memory_space<vmem>>, %arg2: memref<128x384xbf16, #tpu.memory_space<vmem>>, %arg3: memref<1x384xf32, #tpu.memory_space<vmem>>, %arg4: memref<384x128xbf16, #tpu.memory_space<vmem>>, %arg5: memref<1x128xf32, #tpu.memory_space<vmem>>, %arg6: memref<128x128xbf16, #tpu.memory_space<vmem>>, %arg7: memref<1x128xf32, #tpu.memory_space<vmem>>, %arg8: memref<128x128xbf16, #tpu.memory_space<vmem>>, %arg9: memref<1x128xf32, #tpu.memory_space<vmem>>, %arg10: memref<128x384xbf16, #tpu.memory_space<vmem>>, %arg11: memref<1x384xf32, #tpu.memory_space<vmem>>, %arg12: memref<384x128xbf16, #tpu.memory_space<vmem>>, %arg13: memref<1x128xf32, #tpu.memory_space<vmem>>, %arg14: memref<8x2xf32, #tpu.memory_space<vmem>>, %arg15: memref<8x64xf32, #tpu.memory_space<vmem>>) attributes {dimension_semantics = [#tpu.dimension_semantics<parallel>], iteration_bounds = array<i64: 1>, scalar_prefetch = 0 : i64, scratch_operands = 0 : i64, tpu.core_type = #tpu.core_type<tc>, window_params = [{transform_indices = @transform_0, window_bounds = array<i64: 8, 128>}, {pipeline_mode = #tpu.pipeline_mode<synchronous>, transform_indices = @transform_1, window_bounds = array<i64: 128, 384>}, {pipeline_mode = #tpu.pipeline_mode<synchronous>, transform_indices = @transform_2, window_bounds = array<i64: 1, 384>}, {pipeline_mode = #tpu.pipeline_mode<synchronous>, transform_indices = @transform_3, window_bounds = array<i64: 384, 128>}, {pipeline_mode = #tpu.pipeline_mode<synchronous>, transform_indices = @transform_4, window_bounds = array<i64: 1, 128>}, {pipeline_mode = #tpu.pipeline_mode<synchronous>, transform_indices = @transform_5, window_bounds = array<i64: 128, 128>}, {pipeline_mode = #tpu.pipeline_mode<synchronous>, transform_indices = @transform_6, window_bounds = array<i64: 1, 128>}, {pipeline_mode = #tpu.pipeline_mode<synchronous>, transform_indices = @transform_7, window_bounds = array<i64: 128, 128>}, {pipeline_mode = #tpu.pipeline_mode<synchronous>, transform_indices = @transform_8, window_bounds = array<i64: 1, 128>}, {pipeline_mode = #tpu.pipeline_mode<synchronous>, transform_indices = @transform_9, window_bounds = array<i64: 128, 384>}, {pipeline_mode = #tpu.pipeline_mode<synchronous>, transform_indices = @transform_10, window_bounds = array<i64: 1, 384>}, {pipeline_mode = #tpu.pipeline_mode<synchronous>, transform_indices = @transform_11, window_bounds = array<i64: 384, 128>}, {pipeline_mode = #tpu.pipeline_mode<synchronous>, transform_indices = @transform_12, window_bounds = array<i64: 1, 128>}, {transform_indices = @transform_13, window_bounds = array<i64: 8, 2>}, {transform_indices = @transform_14, window_bounds = array<i64: 8, 64>}]} {
    %c0 = arith.constant 0 : index
    %c0_0 = arith.constant 0 : index
    %0 = vector.load %arg1[%c0, %c0_0] : memref<8x128xf32, #tpu.memory_space<vmem>>, vector<8x128xf32>
    %1 = arith.truncf %0 : vector<8x128xf32> to vector<8x128xbf16>
    %c0_1 = arith.constant 0 : index
    %c0_2 = arith.constant 0 : index
    %2 = vector.load %arg2[%c0_1, %c0_2] : memref<128x384xbf16, #tpu.memory_space<vmem>>, vector<128x384xbf16>
    %cst = arith.constant dense<0.000000e+00> : vector<8x384xf32>
    %3 = tpu.matmul %1, %2, %cst {dimension_numbers = #tpu.dot_dimension_numbers<[1], [0], [0], [1], [0, 0, 1, 1], [], []>} : vector<8x128xbf16>, vector<128x384xbf16>, vector<8x384xf32> -> vector<8x384xf32>
    %c0_3 = arith.constant 0 : index
    %c0_4 = arith.constant 0 : index
    %4 = vector.load %arg3[%c0_3, %c0_4] : memref<1x384xf32, #tpu.memory_space<vmem>>, vector<1x384xf32>
    %5 = vector.broadcast %4 : vector<1x384xf32> to vector<8x384xf32>
    %6 = arith.addf %3, %5 : vector<8x384xf32>
    %cst_5 = arith.constant 0.000000e+00 : f32
    %7 = vector.broadcast %cst_5 : f32 to vector<8x384xf32>
    %8 = arith.maximumf %6, %7 : vector<8x384xf32>
    %9 = arith.truncf %8 : vector<8x384xf32> to vector<8x384xbf16>
    %c0_6 = arith.constant 0 : index
    %c0_7 = arith.constant 0 : index
    %10 = vector.load %arg4[%c0_6, %c0_7] : memref<384x128xbf16, #tpu.memory_space<vmem>>, vector<384x128xbf16>
    %cst_8 = arith.constant dense<0.000000e+00> : vector<8x128xf32>
    %11 = tpu.matmul %9, %10, %cst_8 {dimension_numbers = #tpu.dot_dimension_numbers<[1], [0], [0], [1], [0, 0, 1, 1], [], []>} : vector<8x384xbf16>, vector<384x128xbf16>, vector<8x128xf32> -> vector<8x128xf32>
    %c0_9 = arith.constant 0 : index
    %c0_10 = arith.constant 0 : index
    %12 = vector.load %arg5[%c0_9, %c0_10] : memref<1x128xf32, #tpu.memory_space<vmem>>, vector<1x128xf32>
    %13 = vector.broadcast %12 : vector<1x128xf32> to vector<8x128xf32>
    %14 = arith.addf %11, %13 : vector<8x128xf32>
    %cst_11 = arith.constant 0.000000e+00 : f32
    %15 = vector.broadcast %cst_11 : f32 to vector<8x128xf32>
    %16 = arith.maximumf %14, %15 : vector<8x128xf32>
    %17 = arith.truncf %16 : vector<8x128xf32> to vector<8x128xbf16>
    %c0_12 = arith.constant 0 : index
    %c0_13 = arith.constant 0 : index
    %18 = vector.load %arg6[%c0_12, %c0_13] : memref<128x128xbf16, #tpu.memory_space<vmem>>, vector<128x128xbf16>
    %cst_14 = arith.constant dense<0.000000e+00> : vector<8x128xf32>
    %19 = tpu.matmul %17, %18, %cst_14 {dimension_numbers = #tpu.dot_dimension_numbers<[1], [0], [0], [1], [0, 0, 1, 1], [], []>} : vector<8x128xbf16>, vector<128x128xbf16>, vector<8x128xf32> -> vector<8x128xf32>
    %c0_15 = arith.constant 0 : index
    %c0_16 = arith.constant 0 : index
    %20 = vector.load %arg7[%c0_15, %c0_16] : memref<1x128xf32, #tpu.memory_space<vmem>>, vector<1x128xf32>
    %21 = vector.broadcast %20 : vector<1x128xf32> to vector<8x128xf32>
    %22 = arith.addf %19, %21 : vector<8x128xf32>
    %23 = vector.extract_strided_slice %22 {offsets = [0, 0], sizes = [8, 2], strides = [1, 1]} : vector<8x128xf32> to vector<8x2xf32>
    %c0_17 = arith.constant 0 : index
    %c0_18 = arith.constant 0 : index
    %24 = vector.load %arg14[%c0_17, %c0_18] : memref<8x2xf32, #tpu.memory_space<vmem>>, vector<8x2xf32>
    tpu.vector_store %arg14[%c0_17, %c0_18], %23 {strides = array<i32>} : memref<8x2xf32, #tpu.memory_space<vmem>>, vector<8x2xf32>,
    %25 = arith.truncf %22 : vector<8x128xf32> to vector<8x128xbf16>
    %c0_19 = arith.constant 0 : index
    %c0_20 = arith.constant 0 : index
    %26 = vector.load %arg8[%c0_19, %c0_20] : memref<128x128xbf16, #tpu.memory_space<vmem>>, vector<128x128xbf16>
    %cst_21 = arith.constant dense<0.000000e+00> : vector<8x128xf32>
    %27 = tpu.matmul %25, %26, %cst_21 {dimension_numbers = #tpu.dot_dimension_numbers<[1], [0], [0], [1], [0, 0, 1, 1], [], []>} : vector<8x128xbf16>, vector<128x128xbf16>, vector<8x128xf32> -> vector<8x128xf32>
    %c0_22 = arith.constant 0 : index
    %c0_23 = arith.constant 0 : index
    %28 = vector.load %arg9[%c0_22, %c0_23] : memref<1x128xf32, #tpu.memory_space<vmem>>, vector<1x128xf32>
    %29 = vector.broadcast %28 : vector<1x128xf32> to vector<8x128xf32>
    %30 = arith.addf %27, %29 : vector<8x128xf32>
    %cst_24 = arith.constant 0.000000e+00 : f32
    %31 = vector.broadcast %cst_24 : f32 to vector<8x128xf32>
    %32 = arith.maximumf %30, %31 : vector<8x128xf32>
    %33 = arith.truncf %32 : vector<8x128xf32> to vector<8x128xbf16>
    %c0_25 = arith.constant 0 : index
    %c0_26 = arith.constant 0 : index
    %34 = vector.load %arg10[%c0_25, %c0_26] : memref<128x384xbf16, #tpu.memory_space<vmem>>, vector<128x384xbf16>
    %cst_27 = arith.constant dense<0.000000e+00> : vector<8x384xf32>
    %35 = tpu.matmul %33, %34, %cst_27 {dimension_numbers = #tpu.dot_dimension_numbers<[1], [0], [0], [1], [0, 0, 1, 1], [], []>} : vector<8x128xbf16>, vector<128x384xbf16>, vector<8x384xf32> -> vector<8x384xf32>
    %c0_28 = arith.constant 0 : index
    %c0_29 = arith.constant 0 : index
    %36 = vector.load %arg11[%c0_28, %c0_29] : memref<1x384xf32, #tpu.memory_space<vmem>>, vector<1x384xf32>
    %37 = vector.broadcast %36 : vector<1x384xf32> to vector<8x384xf32>
    %38 = arith.addf %35, %37 : vector<8x384xf32>
    %cst_30 = arith.constant 0.000000e+00 : f32
    %39 = vector.broadcast %cst_30 : f32 to vector<8x384xf32>
    %40 = arith.maximumf %38, %39 : vector<8x384xf32>
    %41 = arith.truncf %40 : vector<8x384xf32> to vector<8x384xbf16>
    %c0_31 = arith.constant 0 : index
    %c0_32 = arith.constant 0 : index
    %42 = vector.load %arg12[%c0_31, %c0_32] : memref<384x128xbf16, #tpu.memory_space<vmem>>, vector<384x128xbf16>
    %cst_33 = arith.constant dense<0.000000e+00> : vector<8x128xf32>
    %43 = tpu.matmul %41, %42, %cst_33 {dimension_numbers = #tpu.dot_dimension_numbers<[1], [0], [0], [1], [0, 0, 1, 1], [], []>} : vector<8x384xbf16>, vector<384x128xbf16>, vector<8x128xf32> -> vector<8x128xf32>
    %c0_34 = arith.constant 0 : index
    %c0_35 = arith.constant 0 : index
    %44 = vector.load %arg13[%c0_34, %c0_35] : memref<1x128xf32, #tpu.memory_space<vmem>>, vector<1x128xf32>
    %45 = vector.broadcast %44 : vector<1x128xf32> to vector<8x128xf32>
    %46 = arith.addf %43, %45 : vector<8x128xf32>
    %47 = vector.extract_strided_slice %46 {offsets = [0, 0], sizes = [8, 64], strides = [1, 1]} : vector<8x128xf32> to vector<8x64xf32>
    %c0_36 = arith.constant 0 : index
    %c0_37 = arith.constant 0 : index
    %48 = vector.load %arg15[%c0_36, %c0_37] : memref<8x64xf32, #tpu.memory_space<vmem>>, vector<8x64xf32>
    tpu.vector_store %arg15[%c0_36, %c0_37], %47 {strides = array<i32>} : memref<8x64xf32, #tpu.memory_space<vmem>>, vector<8x64xf32>,
    return
  }
  func.func @transform_0(%arg0: i32) -> (i32, i32) {
    %c0_i32 = arith.constant 0 : i32
    %c0_i32_0 = arith.constant 0 : i32
    return %arg0, %c0_i32 : i32, i32
  }
  func.func @transform_1(%arg0: i32) -> (i32, i32) {
    %c0_i32 = arith.constant 0 : i32
    %c0_i32_0 = arith.constant 0 : i32
    %c0_i32_1 = arith.constant 0 : i32
    return %c0_i32, %c0_i32_0 : i32, i32
  }
  func.func @transform_2(%arg0: i32) -> (i32, i32) {
    %c0_i32 = arith.constant 0 : i32
    %c0_i32_0 = arith.constant 0 : i32
    %c0_i32_1 = arith.constant 0 : i32
    return %c0_i32, %c0_i32_0 : i32, i32
  }
  func.func @transform_3(%arg0: i32) -> (i32, i32) {
    %c0_i32 = arith.constant 0 : i32
    %c0_i32_0 = arith.constant 0 : i32
    %c0_i32_1 = arith.constant 0 : i32
    return %c0_i32, %c0_i32_0 : i32, i32
  }
  func.func @transform_4(%arg0: i32) -> (i32, i32) {
    %c0_i32 = arith.constant 0 : i32
    %c0_i32_0 = arith.constant 0 : i32
    %c0_i32_1 = arith.constant 0 : i32
    return %c0_i32, %c0_i32_0 : i32, i32
  }
  func.func @transform_5(%arg0: i32) -> (i32, i32) {
    %c0_i32 = arith.constant 0 : i32
    %c0_i32_0 = arith.constant 0 : i32
    %c0_i32_1 = arith.constant 0 : i32
    return %c0_i32, %c0_i32_0 : i32, i32
  }
  func.func @transform_6(%arg0: i32) -> (i32, i32) {
    %c0_i32 = arith.constant 0 : i32
    %c0_i32_0 = arith.constant 0 : i32
    %c0_i32_1 = arith.constant 0 : i32
    return %c0_i32, %c0_i32_0 : i32, i32
  }
  func.func @transform_7(%arg0: i32) -> (i32, i32) {
    %c0_i32 = arith.constant 0 : i32
    %c0_i32_0 = arith.constant 0 : i32
    %c0_i32_1 = arith.constant 0 : i32
    return %c0_i32, %c0_i32_0 : i32, i32
  }
  func.func @transform_8(%arg0: i32) -> (i32, i32) {
    %c0_i32 = arith.constant 0 : i32
    %c0_i32_0 = arith.constant 0 : i32
    %c0_i32_1 = arith.constant 0 : i32
    return %c0_i32, %c0_i32_0 : i32, i32
  }
  func.func @transform_9(%arg0: i32) -> (i32, i32) {
    %c0_i32 = arith.constant 0 : i32
    %c0_i32_0 = arith.constant 0 : i32
    %c0_i32_1 = arith.constant 0 : i32
    return %c0_i32, %c0_i32_0 : i32, i32
  }
  func.func @transform_10(%arg0: i32) -> (i32, i32) {
    %c0_i32 = arith.constant 0 : i32
    %c0_i32_0 = arith.constant 0 : i32
    %c0_i32_1 = arith.constant 0 : i32
    return %c0_i32, %c0_i32_0 : i32, i32
  }
  func.func @transform_11(%arg0: i32) -> (i32, i32) {
    %c0_i32 = arith.constant 0 : i32
    %c0_i32_0 = arith.constant 0 : i32
    %c0_i32_1 = arith.constant 0 : i32
    return %c0_i32, %c0_i32_0 : i32, i32
  }
  func.func @transform_12(%arg0: i32) -> (i32, i32) {
    %c0_i32 = arith.constant 0 : i32
    %c0_i32_0 = arith.constant 0 : i32
    %c0_i32_1 = arith.constant 0 : i32
    return %c0_i32, %c0_i32_0 : i32, i32
  }
  func.func @transform_13(%arg0: i32) -> (i32, i32) {
    %c0_i32 = arith.constant 0 : i32
    %c0_i32_0 = arith.constant 0 : i32
    return %arg0, %c0_i32 : i32, i32
  }
  func.func @transform_14(%arg0: i32) -> (i32, i32) {
    %c0_i32 = arith.constant 0 : i32
    %c0_i32_0 = arith.constant 0 : i32
    return %arg0, %c0_i32 : i32, i32
  }
}

</mosaic_0001>

<bundles_post_ra>
// kernel: lenet_300_100_forward.1
= control target key start
LH: loop header
LB: loop body
LE: loop exit
PB: predicated region body
PF: predicated region fallthrough
CT: control target
= control target key end

     0   :  { %20 = vsyncpa [#allocation3], 0  ;;  %s2405_s0 = inlined_call_operand.vmem [shape: f32[8,128], index: 0, kind: input, shape index: {}]   ;;  %s2406_s1 = inlined_call_operand.hbm [shape: bf16[128,384], index: 1, kind: input, shape index: {}]   ;;  %s2407_s2 = inlined_call_operand.vmem [shape: f32[1,384], index: 2, kind: input, shape index: {}]   ;;  %s2408_s3 = inlined_call_operand.hbm [shape: bf16[384,128], index: 3, kind: input, shape index: {}]   ;;  %s2409_s4 = inlined_call_operand.vmem [shape: f32[1,128], index: 4, kind: input, shape index: {}]   ;;  %s2410_s5 = inlined_call_operand.hbm [shape: bf16[128,128], index: 5, kind: input, shape index: {}]   ;;  %s2411_s6 = inlined_call_operand.vmem [shape: f32[1,128], index: 6, kind: input, shape index: {}]   ;;  %s2412_s7 = inlined_call_operand.hbm [shape: bf16[128,128], index: 7, kind: input, shape index: {}]   ;;  %s2413_s8 = inlined_call_operand.vmem [shape: f32[1,128], index: 8, kind: input, shape index: {}]   ;;  %s2414_s9 = inlined_call_operand.hbm [shape: bf16[128,384], index: 9, kind: input, shape index: {}]   ;;  %s2415_s10 = inlined_call_operand.vmem [shape: f32[1,384], index: 10, kind: input, shape index: {}]   ;;  %s2416_s11 = inlined_call_operand.hbm [shape: bf16[384,128], index: 11, kind: input, shape index: {}]   ;;  %s2417_s12 = inlined_call_operand.vmem [shape: f32[1,128], index: 12, kind: input, shape index: {}]   ;;  %s2418_s13 = inlined_call_operand.vmem [shape: f32[8,2], index: 13, kind: output, shape index: {0}]   ;;  %s2419_s14 = inlined_call_operand.hbm [shape: f32[8,64], index: 14, kind: output, shape index: {1}]  }
   0x1   :  { %21 = vsyncpa [#allocation6], 0 }
   0x2   :  { %22 = vsyncpa [#allocation9], 0 }
   0x3   :  { %23 = vsyncpa [#allocation12], 0 }
   0x4   :  { %24 = vsyncpa [#allocation4], 0  ;;  %s2111_s29 = smov [#allocation5]   ;;  %s1947_s17 = scalar_lea.hbm %s2408_s3, 3072 }
   0x5   :  { %s46_s30 = sshll.u32 %s2111_s29, 4  ;;  %p1948_p0 = scmp.ne.s32.totalorder %s2408_s3, %s1947_s17  ;;  %s47_s30 = int_to_ptr.vmem [resolvable:$true] %s46_s30 }
   0x6   :  { %p1951_p1 = scmp.lt.u32.totalorder %s1947_s17, %s2408_s3 }
   0x8   :  { %p1953_p2 = pnand %p1951_p1, %p1948_p0 }
   0xa   :  { %1956 = shalt.err (!%p1953_p2)
}
   0xb   :  { %s1957_s22 = scalar_lea.vmem %s47_s30, 3072  ;;  %p1962_p4 = scmp.lt.s32.totalorder %s47_s30, %s47_s30 }
   0xc   :  { %p1958_p3 = scmp.ne.s32.totalorder %s47_s30, %s1957_s22  ;;  %p1963_p5 = scmp.lt.s32.totalorder %s1957_s22, %s1957_s22 }
   0xe   :  { %p1964_p6 = por %p1963_p5, %p1962_p4 }
  0x10   :  { %p1965_p7 = pnand %p1964_p6, %p1958_p3 }
  0x12   :  { %1968 = shalt.err (!%p1965_p7)
}
  0x13   :  { %s2112_s23 = smov 64   ;;  %s2113_s24 = smov 4  }
  0x14   :  { %52 = dma.hbm_to_vmem [thread:$0]  %s2408_s3, 3072, %s47_s30, [#allocation6], %s2112_s23, %s2112_s23, %s2113_s24  }
  0x15   :  { %s2114_s27 = smov [#allocation8]   ;;  %s2115_s29 = smov [#allocation2]  }
  0x16   :  { %s74_s28 = sshll.u32 %s2114_s27, 4  ;;  %s32_s15 = sshll.u32 %s2115_s29, 4  ;;  %s75_s28 = int_to_ptr.vmem [resolvable:$true] %s74_s28  ;;  %s33_s15 = int_to_ptr.vmem [resolvable:$true] %s32_s15 }
  0x17   :  { %s1969_s18 = scalar_lea.hbm %s2412_s7, 1024 }
  0x18   :  { %p1970_p8 = scmp.ne.s32.totalorder %s2412_s7, %s1969_s18  ;;  %p1973_p9 = scmp.lt.u32.totalorder %s1969_s18, %s2412_s7 }
  0x1a   :  { %p1975_p10 = pnand %p1973_p9, %p1970_p8 }
  0x1c   :  { %1978 = shalt.err (!%p1975_p10)
}
  0x1d   :  { %s1979_s3 = scalar_lea.vmem %s75_s28, 1024  ;;  %p1984_p12 = scmp.lt.s32.totalorder %s75_s28, %s75_s28 }
  0x1e   :  { %p1980_p11 = scmp.ne.s32.totalorder %s75_s28, %s1979_s3  ;;  %p1985_p13 = scmp.lt.s32.totalorder %s1979_s3, %s1979_s3 }
  0x20   :  { %p1986_p0 = por %p1985_p13, %p1984_p12 }
  0x22   :  { %p1987_p1 = pnand %p1986_p0, %p1980_p11 }
  0x24   :  { %1990 = shalt.err (!%p1987_p1)
}
  0x25   :  { %80 = dma.hbm_to_vmem [thread:$0]  %s2412_s7, 1024, %s75_s28, [#allocation9], %s2112_s23, %s2112_s23, %s2113_s24  }
  0x26   :  { %s1991_s29 = scalar_lea.hbm %s2406_s1, 3072 }
  0x27   :  { %p1992_p2 = scmp.ne.s32.totalorder %s2406_s1, %s1991_s29  ;;  %p1995_p3 = scmp.lt.u32.totalorder %s1991_s29, %s2406_s1 }
  0x29   :  { %p1997_p4 = pnand %p1995_p3, %p1992_p2 }
  0x2b   :  { %2000 = shalt.err (!%p1997_p4)
}
  0x2c   :  { %s2001_s20 = scalar_lea.vmem %s33_s15, 3072  ;;  %p2006_p6 = scmp.lt.s32.totalorder %s33_s15, %s33_s15 }
  0x2d   :  { %p2002_p5 = scmp.ne.s32.totalorder %s33_s15, %s2001_s20  ;;  %p2007_p7 = scmp.lt.s32.totalorder %s2001_s20, %s2001_s20 }
  0x2f   :  { %p2008_p8 = por %p2007_p7, %p2006_p6 }
  0x31   :  { %p2009_p9 = pnand %p2008_p8, %p2002_p5 }
  0x33   :  { %2012 = shalt.err (!%p2009_p9)
}
  0x34   :  { %s2116_s7 = smov 192   ;;  %s2117_s28 = smov 12  }
  0x35   :  { %38 = dma.hbm_to_vmem [thread:$0]  %s2406_s1, 3072, %s33_s15, [#allocation3], %s2116_s7, %s2116_s7, %s2117_s28  }
  0x36   :  { %s2118_s3 = smov [#allocation7]   ;;  %s2119_s25 = smov [#allocation10]  }
  0x37   :  { %s60_s30 = sshll.u32 %s2118_s3, 4  ;;  %s88_s26 = sshll.u32 %s2119_s25, 4  ;;  %s61_s30 = int_to_ptr.vmem [resolvable:$true] %s60_s30  ;;  %s89_s26 = int_to_ptr.vmem [resolvable:$true] %s88_s26 }
  0x38   :  { %s2013_s16 = scalar_lea.hbm %s2410_s5, 1024 }
  0x39   :  { %p2014_p10 = scmp.ne.s32.totalorder %s2410_s5, %s2013_s16  ;;  %p2017_p11 = scmp.lt.u32.totalorder %s2013_s16, %s2410_s5 }
  0x3b   :  { %p2019_p12 = pnand %p2017_p11, %p2014_p10 }
  0x3d   :  { %2022 = shalt.err (!%p2019_p12)
}
  0x3e   :  { %s2023_s1 = scalar_lea.vmem %s61_s30, 1024  ;;  %p2028_p0 = scmp.lt.s32.totalorder %s61_s30, %s61_s30 }
  0x3f   :  { %p2024_p13 = scmp.ne.s32.totalorder %s61_s30, %s2023_s1  ;;  %p2029_p1 = scmp.lt.s32.totalorder %s2023_s1, %s2023_s1 }
  0x41   :  { %p2030_p2 = por %p2029_p1, %p2028_p0 }
  0x43   :  { %p2031_p3 = pnand %p2030_p2, %p2024_p13 }
  0x45   :  { %2034 = shalt.err (!%p2031_p3)
}
  0x46   :  { %66 = dma.hbm_to_vmem [thread:$0]  %s2410_s5, 1024, %s61_s30, [#allocation6], %s2112_s23, %s2112_s23, %s2113_s24  }
  0x47   :  { %s2035_s25 = scalar_lea.hbm %s2414_s9, 3072 }
  0x48   :  { %p2036_p4 = scmp.ne.s32.totalorder %s2414_s9, %s2035_s25  ;;  %p2039_p5 = scmp.lt.u32.totalorder %s2035_s25, %s2414_s9 }
  0x4a   :  { %p2041_p6 = pnand %p2039_p5, %p2036_p4 }
  0x4c   :  { %2044 = shalt.err (!%p2041_p6)
}
  0x4d   :  { %s2045_s18 = scalar_lea.vmem %s89_s26, 3072  ;;  %p2050_p8 = scmp.lt.s32.totalorder %s89_s26, %s89_s26 }
  0x4e   :  { %p2046_p7 = scmp.ne.s32.totalorder %s89_s26, %s2045_s18  ;;  %p2051_p9 = scmp.lt.s32.totalorder %s2045_s18, %s2045_s18 }
  0x50   :  { %p2052_p10 = por %p2051_p9, %p2050_p8 }
  0x52   :  { %p2053_p11 = pnand %p2052_p10, %p2046_p7 }
  0x54   :  { %2056 = shalt.err (!%p2053_p11)
}
  0x55   :  { %94 = dma.hbm_to_vmem [thread:$0]  %s2414_s9, 3072, %s89_s26, [#allocation9], %s2116_s7, %s2116_s7, %s2117_s28  }
  0x56   :  { %s2120_s19 = smov [#allocation11]   ;;  %s2057_s21 = scalar_lea.hbm %s2416_s11, 3072 }
  0x57   :  { %s102_s20 = sshll.u32 %s2120_s19, 4  ;;  %p2058_p12 = scmp.ne.s32.totalorder %s2416_s11, %s2057_s21  ;;  %s103_s20 = int_to_ptr.vmem [resolvable:$true] %s102_s20 }
  0x58   :  { %p2061_p13 = scmp.lt.u32.totalorder %s2057_s21, %s2416_s11 }
  0x5a   :  { %p2063_p0 = pnand %p2061_p13, %p2058_p12 }
  0x5c   :  { %2066 = shalt.err (!%p2063_p0)
}
  0x5d   :  { %s2067_s29 = scalar_lea.vmem %s103_s20, 3072  ;;  %p2072_p2 = scmp.lt.s32.totalorder %s103_s20, %s103_s20 }
  0x5e   :  { %p2068_p1 = scmp.ne.s32.totalorder %s103_s20, %s2067_s29  ;;  %p2073_p3 = scmp.lt.s32.totalorder %s2067_s29, %s2067_s29 }
  0x60   :  { %p2074_p4 = por %p2073_p3, %p2072_p2 }
  0x62   :  { %p2075_p5 = pnand %p2074_p4, %p2068_p1 }
  0x64   :  { %2078 = shalt.err (!%p2075_p5)
}
  0x65   :  { %108 = dma.hbm_to_vmem [thread:$0]  %s2416_s11, 3072, %s103_s20, [#allocation12], %s2112_s23, %s2112_s23, %s2113_s24  }
  0x66   :  { %2101 = dma.done.wait [#allocation3], 3072  }
  0x67   :  { %2102 = vsyncadd [#allocation3], 4294964224 }
  0x68   :  { %2103 = dma.done.wait [#allocation6], 4096  }
  0x69   :  { %2104 = vsyncadd [#allocation6], 4294963200 }
  0x6a   :  { %2105 = dma.done.wait [#allocation9], 4096  }
  0x6b   :  { %2106 = vsyncadd [#allocation9], 4294963200 }
  0x6c   :  { %2107 = dma.done.wait [#allocation12], 3072  }
  0x6d   :  { %2108 = vsyncadd [#allocation12], 4294964224  ;;  %v2121_v0 = vmov 0.0   ;;  %v2122_v1 = vmov 0   ;;  %vm2123_vm0 = vmmov 0   ;;  %v130_v25 = vld [vmem:[%s2405_s0] sm:$0xff]  ;;  %v166_v52 = vlaneseq }
  0x6e   :  { %1685 = vmatprep.subr.bf16.mxu1 %v2121_v0  ;;  %341 = vmatprep.mubr.bf16.mxu0 %v2122_v1  ;;  %v1819_v2 = vld [vmem:[#allocation2 + $0x4] ss:$12 sps:$4 sm:$0xff]   ;;  %v1821_v3 = vld [vmem:[#allocation2] ss:$12 sps:$4 sm:$0xff]   ;;  %v1822_v4 = vld [vmem:[#allocation2 + $0x1c] ss:$12 sps:$4 sm:$0xff]   ;;  %v131_v28 = vpack.c.bf16 %v130_v25, %v130_v25 }
  0x6f   :  { %1701 = vmatprep.mubr.msk.bf16.mxu1 %vm2123_vm0, %v2121_v0  ;;  %309 = vmatprep.subr.bf16.mxu0 %v1819_v2  ;;  %v1824_v5 = vld [vmem:[#allocation2 + $0x18] ss:$12 sps:$4 sm:$0xff]   ;;  %v1825_v6 = vld [vmem:[#allocation2 + $0x8] ss:$12 sps:$4 sm:$0xff]   ;;  %v1829_v8 = vld [vmem:[#allocation2 + $0x20] ss:$12 sps:$4 sm:$0xff]  }
  0x70   :  { %310 = vmatpush1.bf16.msra.mxu0 %v1821_v3  ;;  %v1826_v7 = vld [vmem:[#allocation2 + $0x34] ss:$12 sps:$4 sm:$0xff]   ;;  %1686 = vmatpush3.bf16.msra.mxu1 %v1825_v6  ;;  %v1828_v9 = vld [vmem:[#allocation2 + $0x30] ss:$12 sps:$4 sm:$0xff]   ;;  %v1830_v10 = vld [vmem:[#allocation2 + $0x4c] ss:$12 sps:$4 sm:$0xff]  }
  0x71   :  { %311 = vmatprep.subr.bf16.mxu0 %v1822_v4  ;;  %1687 = vmatprep.subr.bf16.mxu1 %v2121_v0  ;;  %v1833_v11 = vld [vmem:[#allocation2 + $0x38] ss:$12 sps:$4 sm:$0xff]   ;;  %v1832_v12 = vld [vmem:[#allocation2 + $0x48] ss:$12 sps:$4 sm:$0xff]   ;;  %v1837_v14 = vld [vmem:[#allocation2 + $0x50] ss:$12 sps:$4 sm:$0xff]  }
  0x72   :  { %v1834_v13 = vld [vmem:[#allocation2 + $0x64] ss:$12 sps:$4 sm:$0xff]   ;;  %v1836_v15 = vld [vmem:[#allocation2 + $0x60] ss:$12 sps:$4 sm:$0xff]   ;;  %v1838_v16 = vld [vmem:[#allocation2 + $0x7c] ss:$12 sps:$4 sm:$0xff]  }
  0x73   :  { %v1841_v17 = vld [vmem:[#allocation2 + $0x68] ss:$12 sps:$4 sm:$0xff]   ;;  %v1840_v18 = vld [vmem:[#allocation2 + $0x78] ss:$12 sps:$4 sm:$0xff]   ;;  %v1845_v20 = vld [vmem:[#allocation2 + $0x80] ss:$12 sps:$4 sm:$0xff]  }
  0x74   :  { %312 = vmatpush1.bf16.msra.mxu0 %v1824_v5  ;;  %1688 = vmatpush3.bf16.msra.mxu1 %v1829_v8  ;;  %v1842_v19 = vld [vmem:[#allocation2 + $0x94] ss:$12 sps:$4 sm:$0xff]   ;;  %v1844_v21 = vld [vmem:[#allocation2 + $0x90] ss:$12 sps:$4 sm:$0xff]   ;;  %v1846_v22 = vld [vmem:[#allocation2 + $0xac] ss:$12 sps:$4 sm:$0xff]  }
  0x75   :  { %313 = vmatprep.subr.bf16.mxu0 %v1826_v7  ;;  %1689 = vmatprep.subr.bf16.mxu1 %v2121_v0  ;;  %v1849_v23 = vld [vmem:[#allocation2 + $0x98] ss:$12 sps:$4 sm:$0xff]   ;;  %v1848_v24 = vld [vmem:[#allocation2 + $0xa8] ss:$12 sps:$4 sm:$0xff]   ;;  %v1850_v27 = vld [vmem:[#allocation2 + $0xb0] ss:$12 sps:$4 sm:$0xff]  }
  0x76   :  { %v1851_v26 = vld [vmem:[#allocation5 + $0x40] sm:$0xff]   ;;  %v1854_v30 = vld [vmem:[#allocation5 + $0x48] sm:$0xff]   ;;  %v1857_v34 = vld [vmem:[#allocation5 + $0x50] sm:$0xff]   ;;  %v2316_v53 = vshrl.u32 %v166_v52, 7  ;;  %vm788_vm1 = vcmask 15360   ;;  %s2124_s30 = smov [#allocation13]  }
  0x77   :  { %v1852_v29 = vld [vmem:[#allocation5] sm:$0xff]   ;;  %v1855_v32 = vld [vmem:[#allocation5 + $0x8] sm:$0xff]   ;;  %v1858_v35 = vld [vmem:[#allocation5 + $0x10] sm:$0xff]   ;;  %s1457_s19 = sshll.u32 %s2124_s30, 4  ;;  %vm1447_vm2 = vcmask 523264   ;;  %s1458_s19 = int_to_ptr.vmem [resolvable:$true] %s1457_s19 }
  0x78   :  { %314 = vmatpush1.bf16.msra.mxu0 %v1828_v9  ;;  %1690 = vmatpush3.bf16.msra.mxu1 %v1833_v11  ;;  %v1853_v31 = vld [vmem:[#allocation5 + $0x80] sm:$0xff]   ;;  %v1856_v33 = vld [vmem:[#allocation5 + $0x88] sm:$0xff]   ;;  %v1860_v36 = vld [vmem:[#allocation5 + $0x58] sm:$0xff]   ;;  %v168_v54 = vsub.s32 0, %v2316_v53  ;;  %v172_v56 = vsub.s32 1, %v2316_v53  ;;  %v176_v57 = vsub.s32 2, %v2316_v53  ;;  %p2084_p7 = scmp.lt.s32.totalorder %s1458_s19, %s1458_s19 }
  0x79   :  { %315 = vmatprep.subr.bf16.mxu0 %v1830_v10  ;;  %1691 = vmatprep.subr.bf16.mxu1 %v2121_v0  ;;  %v1859_v37 = vld [vmem:[#allocation5 + $0x90] sm:$0xff]   ;;  %v1861_v38 = vld [vmem:[#allocation5 + $0x18] sm:$0xff]   ;;  %v1863_v39 = vld [vmem:[#allocation5 + $0x60] sm:$0xff]   ;;  %s2079_s20 = scalar_lea.vmem %s1458_s19, 128 }
  0x7a   :  { %v1862_v40 = vld [vmem:[#allocation5 + $0x98] sm:$0xff]   ;;  %v1864_v41 = vld [vmem:[#allocation5 + $0x20] sm:$0xff]   ;;  %v1866_v42 = vld [vmem:[#allocation5 + $0x68] sm:$0xff]   ;;  %p2080_p6 = scmp.ne.s32.totalorder %s1458_s19, %s2079_s20  ;;  %p2085_p8 = scmp.lt.s32.totalorder %s2079_s20, %s2079_s20 }
  0x7b   :  { %v1865_v43 = vld [vmem:[#allocation5 + $0xa0] sm:$0xff]   ;;  %v1867_v44 = vld [vmem:[#allocation5 + $0x28] sm:$0xff]   ;;  %v1869_v46 = vld [vmem:[#allocation5 + $0x70] sm:$0xff]  }
  0x7c   :  { %316 = vmatpush1.bf16.msra.mxu0 %v1832_v12  ;;  %1692 = vmatpush3.bf16.msra.mxu1 %v1837_v14  ;;  %v1868_v45 = vld [vmem:[#allocation5 + $0xa8] sm:$0xff]   ;;  %v1870_v47 = vld [vmem:[#allocation5 + $0x30] sm:$0xff]   ;;  %v1872_v49 = vld [vmem:[#allocation5 + $0x78] sm:$0xff]   ;;  %p2086_p9 = por %p2085_p8, %p2084_p7 }
  0x7d   :  { %317 = vmatprep.subr.bf16.mxu0 %v1834_v13  ;;  %1693 = vmatprep.subr.bf16.mxu1 %v2121_v0  ;;  %v1871_v48 = vld [vmem:[#allocation5 + $0xb0] sm:$0xff]   ;;  %v1873_v50 = vld [vmem:[#allocation5 + $0x38] sm:$0xff]   ;;  %v164_v55 = vld [vmem:[%s2407_s2] sm:$0x7] }
  0x7e   :  { %v1874_v51 = vld [vmem:[#allocation5 + $0xb8] sm:$0xff]   ;;  %v169_v58 = vrot.slane %v164_v55, %v168_v54  ;;  %v173_v59 = vrot.slane %v164_v55, %v172_v56  ;;  %v177_v60 = vrot.slane %v164_v55, %v176_v57  ;;  %v1875_v14 = vld [vmem:[#allocation7] sm:$0xff]   ;;  %v1884_v25 = vld [vmem:[#allocation8 + $0x8] sm:$0xff]   ;;  %p2087_p10 = pnand %p2086_p9, %p2080_p6 }
  0x7f   :  { %v1905_v52 = vld [vmem:[#allocation10 + $0x4c] ss:$12 sps:$4 sm:$0xff]   ;;  %v1903_v55 = vld [vmem:[#allocation10 + $0x48] ss:$12 sps:$4 sm:$0xff]  }
  0x80   :  { %318 = vmatpush1.bf16.msra.mxu0 %v1836_v15  ;;  %1694 = vmatpush3.bf16.msra.mxu1 %v1841_v17  ;;  %v1876_v17 = vld [vmem:[#allocation7 + $0x8] sm:$0xff]  }
  0x81   :  { %319 = vmatprep.subr.bf16.mxu0 %v1838_v16  ;;  %1695 = vmatprep.subr.bf16.mxu1 %v2121_v0 }
  0x84   :  { %320 = vmatpush1.bf16.msra.mxu0 %v1840_v18  ;;  %1696 = vmatpush3.bf16.msra.mxu1 %v1845_v20  ;;  %v1877_v18 = vld [vmem:[#allocation7 + $0x10] sm:$0xff]   ;;  %v1879_v20 = vld [vmem:[#allocation7 + $0x20] sm:$0xff]  }
  0x85   :  { %321 = vmatprep.subr.bf16.mxu0 %v1842_v19  ;;  %1697 = vmatprep.subr.bf16.mxu1 %v2121_v0  ;;  %v1878_v19 = vld [vmem:[#allocation7 + $0x18] sm:$0xff]  }
  0x88   :  { %322 = vmatpush1.bf16.msra.mxu0 %v1844_v21  ;;  %1698 = vmatpush3.bf16.msra.mxu1 %v1849_v23  ;;  %v1880_v21 = vld [vmem:[#allocation7 + $0x28] sm:$0xff]   ;;  %v1882_v23 = vld [vmem:[#allocation7 + $0x38] sm:$0xff]  }
  0x89   :  { %323 = vmatprep.subr.bf16.mxu0 %v1846_v22  ;;  %1699 = vmatprep.subr.bf16.mxu1 %v2121_v0  ;;  %v1881_v22 = vld [vmem:[#allocation7 + $0x30] sm:$0xff]  }
  0x8c   :  { %324 = vmatpush1.bf16.msra.mxu0 %v1848_v24  ;;  %1700 = vmatpush3.bf16.msra.mxu1 %v1850_v27  ;;  %v1883_v24 = vld [vmem:[#allocation8] sm:$0xff]   ;;  %v1886_v27 = vld [vmem:[#allocation8 + $0x18] sm:$0xff]  }
  0x8d   :  { %1596 = vmatprep.subr.bf16.mxu0 %v1851_v26  ;;  %1705 = vmatprep.subr.bf16.mxu1 %v2121_v0  ;;  %v1885_v26 = vld [vmem:[#allocation8 + $0x10] sm:$0xff]  }
  0x8f   :  { %342 = vmatmul.mubr.bf16.vlgmr.msra.gmra.mrb[0].mxu0 %v131_v28  ;;  %1702 = vmatmul.mubr.bf16.vlgmr.msra.gmra.mrb[0].mxu1 %v131_v28  ;;  %v1887_v28 = vld [vmem:[#allocation8 + $0x20] sm:$0xff]  }
  0x90   :  { %1597 = vmatpush3.bf16.msra.mxu0 %v1852_v29  ;;  %1706 = vmatpush3.bf16.msra.mxu1 %v1853_v31  ;;  %v1888_v29 = vld [vmem:[#allocation8 + $0x28] sm:$0xff]  }
  0x91   :  { %1598 = vmatprep.subr.bf16.mxu0 %v1854_v30  ;;  %1721 = vmatprep.mubr.msk.bf16.mxu1 %vm2123_vm0, %v2121_v0  ;;  %v1889_v30 = vld [vmem:[#allocation8 + $0x30] sm:$0xff]  }
  0x92   :  { %1707 = vmatprep.subr.bf16.mxu1 %v2121_v0 }
  0x94   :  { %1599 = vmatpush3.bf16.msra.mxu0 %v1855_v32  ;;  %1708 = vmatpush3.bf16.msra.mxu1 %v1856_v33 }
  0x95   :  { %1600 = vmatprep.subr.bf16.mxu0 %v1857_v34  ;;  %1709 = vmatprep.subr.bf16.mxu1 %v2121_v0  ;;  %v1495_v34 = vld [vmem:[%s2409_s4] ss:$0 sm:$0xff] }
  0x98   :  { %1601 = vmatpush3.bf16.msra.mxu0 %v1858_v35  ;;  %1710 = vmatpush3.bf16.msra.mxu1 %v1859_v37 }
  0x99   :  { %1602 = vmatprep.subr.bf16.mxu0 %v1860_v36  ;;  %1711 = vmatprep.subr.bf16.mxu1 %v2121_v0 }
  0x9c   :  { %1603 = vmatpush3.bf16.msra.mxu0 %v1861_v38  ;;  %1712 = vmatpush3.bf16.msra.mxu1 %v1862_v40 }
  0x9d   :  { %1604 = vmatprep.subr.bf16.mxu0 %v1863_v39  ;;  %1713 = vmatprep.subr.bf16.mxu1 %v2121_v0 }
  0xa0   :  { %1605 = vmatpush3.bf16.msra.mxu0 %v1864_v41  ;;  %1714 = vmatpush3.bf16.msra.mxu1 %v1865_v43 }
  0xa1   :  { %1606 = vmatprep.subr.bf16.mxu0 %v1866_v42  ;;  %1715 = vmatprep.subr.bf16.mxu1 %v2121_v0 }
  0xa4   :  { %1607 = vmatpush3.bf16.msra.mxu0 %v1867_v44  ;;  %1716 = vmatpush3.bf16.msra.mxu1 %v1868_v45  ;;  %v1890_v45 = vld [vmem:[#allocation8 + $0x38] sm:$0xff]  }
  0xa5   :  { %1608 = vmatprep.subr.bf16.mxu0 %v1869_v46  ;;  %1717 = vmatprep.subr.bf16.mxu1 %v2121_v0  ;;  %v1891_v46 = vld [vmem:[#allocation10] ss:$12 sps:$4 sm:$0xff]  }
  0xa8   :  { %1609 = vmatpush3.bf16.msra.mxu0 %v1870_v47  ;;  %1718 = vmatpush3.bf16.msra.mxu1 %v1871_v48  ;;  %v1893_v47 = vld [vmem:[#allocation10 + $0x4] ss:$12 sps:$4 sm:$0xff]   ;;  %v1897_v48 = vld [vmem:[#allocation10 + $0x1c] ss:$12 sps:$4 sm:$0xff]  }
  0xa9   :  { %1610 = vmatprep.subr.bf16.mxu0 %v1872_v49  ;;  %1719 = vmatprep.subr.bf16.mxu1 %v2121_v0  ;;  %v1895_v49 = vld [vmem:[#allocation10 + $0x18] ss:$12 sps:$4 sm:$0xff]  }
  0xac   :  { %1611 = vmatpush3.bf16.msra.mxu0 %v1873_v50  ;;  %1720 = vmatpush3.bf16.msra.mxu1 %v1874_v51  ;;  %v1901_v50 = vld [vmem:[#allocation10 + $0x34] ss:$12 sps:$4 sm:$0xff]   ;;  %v1899_v51 = vld [vmem:[#allocation10 + $0x30] ss:$12 sps:$4 sm:$0xff]  }
  0xad   :  { %1725 = vmatprep.subr.bf16.mxu0 %v2121_v0  ;;  %1745 = vmatprep.subr.bf16.mxu1 %v2121_v0 }
 0x162   :  { %v343_v61 = vpop.f32.mrb[0].mxu0  ;;  %v384_v4 = vpop.f32.mrb[0].mxu1 }
 0x163   :  { %v344_v62 = vadd.f32 %v343_v61, %v169_v58  ;;  %v345_v63 = vpop.f32.mrb[1].mxu0  ;;  %v385_v7 = vadd.f32 %v384_v4, %v177_v60  ;;  %v1703_v8 = vpop.f32.mrb[1].mxu1  ;;  %v1907_v58 = vld [vmem:[#allocation10 + $0x60] ss:$12 sps:$4 sm:$0xff]   ;;  %v1911_v60 = vld [vmem:[#allocation10 + $0x78] ss:$12 sps:$4 sm:$0xff]  }
 0x164   :  { %v346_v2 = vadd.f32 %v345_v63, %v173_v59  ;;  %v347_v3 = vpop.f32.mrb[2].mxu0  ;;  %v387_v10 = vpop.f32.mrb[2].mxu1  ;;  %v1913_v59 = vld [vmem:[#allocation10 + $0x7c] ss:$12 sps:$4 sm:$0xff]   ;;  %v1917_v61 = vld [vmem:[#allocation10 + $0x94] ss:$12 sps:$4 sm:$0xff]  }
 0x165   :  { %v390_v5 = vmax.f32 %v344_v62, 0.0  ;;  %v348_v6 = vpop.f32.mrb[3].mxu0  ;;  %v392_v11 = vmax.f32 %v385_v7, 0.0  ;;  %v1704_v12 = vpop.f32.mrb[3].mxu1  ;;  %v1915_v62 = vld [vmem:[#allocation10 + $0x90] ss:$12 sps:$4 sm:$0xff]  }
 0x166   :  { %v391_v9 = vmax.f32 %v346_v2, 0.0  ;;  %v1520_v63 = vld [vmem:[%s2411_s6] ss:$0 sm:$0xff]  ;;  %v1894_v6 = vld [vmem:[#allocation10 + $0x8] ss:$12 sps:$4 sm:$0xff]  }
 0x167   :  { %v393_v15 = vpack.c.bf16 %v390_v5, %v390_v5  ;;  %v395_v16 = vpack.c.bf16 %v392_v11, %v392_v11  ;;  %v1902_v10 = vld [vmem:[#allocation10 + $0x38] ss:$12 sps:$4 sm:$0xff]   ;;  %v1906_v11 = vld [vmem:[#allocation10 + $0x50] ss:$12 sps:$4 sm:$0xff]   ;;  %v1910_v12 = vld [vmem:[#allocation10 + $0x68] ss:$12 sps:$4 sm:$0xff]  }
 0x168   :  { %v394_v13 = vpack.c.bf16 %v391_v9, %v391_v9  ;;  %v1898_v9 = vld [vmem:[#allocation10 + $0x20] ss:$12 sps:$4 sm:$0xff]  }
 0x169   :  { %1722 = vmatmul.mubr.bf16.vlgmr.msra.gmra.mrb[4].mxu1 %v395_v16  ;;  %v1919_v16 = vld [vmem:[#allocation10 + $0xa8] ss:$12 sps:$4 sm:$0xff]  }
 0x16a   :  { %627 = vmatprep.mubr.bf16.mxu0 %v394_v13  ;;  %1761 = vmatprep.mubr.msk.bf16.mxu1 %vm2123_vm0, %v2121_v0  ;;  %v1914_v13 = vld [vmem:[#allocation10 + $0x80] ss:$12 sps:$4 sm:$0xff]  }
 0x16b   :  { %628 = vmatmul.mubr.bf16.vlgmr.msra.gmra.mrb[4].mxu0 %v393_v15  ;;  %1746 = vmatpush3.bf16.msra.mxu1 %v1883_v24  ;;  %v1921_v15 = vld [vmem:[#allocation10 + $0xac] ss:$12 sps:$4 sm:$0xff]  }
 0x16c   :  { %1726 = vmatpush3.bf16.msra.mxu0 %v1875_v14  ;;  %1741 = vmatprep.mubr.msk.bf16.mxu0 %vm2123_vm0, %v2121_v0  ;;  %v1918_v14 = vld [vmem:[#allocation10 + $0x98] ss:$12 sps:$4 sm:$0xff]  }
 0x16d   :  { %1727 = vmatprep.subr.bf16.mxu0 %v2121_v0  ;;  %1747 = vmatprep.subr.bf16.mxu1 %v2121_v0 }
 0x16f   :  { %1748 = vmatpush3.bf16.msra.mxu1 %v1884_v25 }
 0x170   :  { %1728 = vmatpush3.bf16.msra.mxu0 %v1876_v17  ;;  %1749 = vmatprep.subr.bf16.mxu1 %v2121_v0  ;;  %v1922_v17 = vld [vmem:[#allocation10 + $0xb0] ss:$12 sps:$4 sm:$0xff]  }
 0x171   :  { %1729 = vmatprep.subr.bf16.mxu0 %v2121_v0 }
 0x173   :  { %1750 = vmatpush3.bf16.msra.mxu1 %v1885_v26  ;;  %v1923_v26 = vld [vmem:[#allocation11 + $0x80] sm:$0xff]  }
 0x174   :  { %1730 = vmatpush3.bf16.msra.mxu0 %v1877_v18  ;;  %1751 = vmatprep.subr.bf16.mxu1 %v2121_v0  ;;  %v1924_v18 = vld [vmem:[#allocation11 + $0x40] sm:$0xff]  }
 0x175   :  { %1731 = vmatprep.subr.bf16.mxu0 %v2121_v0 }
 0x177   :  { %1752 = vmatpush3.bf16.msra.mxu1 %v1886_v27  ;;  %v1925_v27 = vld [vmem:[#allocation11] sm:$0xff]  }
 0x178   :  { %1732 = vmatpush3.bf16.msra.mxu0 %v1878_v19  ;;  %1753 = vmatprep.subr.bf16.mxu1 %v2121_v0  ;;  %v1529_v19 = vld [vmem:[%s2413_s8] ss:$0 sm:$0xff] }
 0x179   :  { %1733 = vmatprep.subr.bf16.mxu0 %v2121_v0 }
 0x17b   :  { %1754 = vmatpush3.bf16.msra.mxu1 %v1887_v28 }
 0x17c   :  { %1734 = vmatpush3.bf16.msra.mxu0 %v1879_v20  ;;  %1755 = vmatprep.subr.bf16.mxu1 %v2121_v0 }
 0x17d   :  { %1735 = vmatprep.subr.bf16.mxu0 %v2121_v0 }
 0x17f   :  { %1756 = vmatpush3.bf16.msra.mxu1 %v1888_v29  ;;  %v1927_v29 = vld [vmem:[#allocation11 + $0x48] sm:$0xff]  }
 0x180   :  { %1736 = vmatpush3.bf16.msra.mxu0 %v1880_v21  ;;  %1757 = vmatprep.subr.bf16.mxu1 %v2121_v0 }
 0x181   :  { %1737 = vmatprep.subr.bf16.mxu0 %v2121_v0 }
 0x183   :  { %1758 = vmatpush3.bf16.msra.mxu1 %v1889_v30  ;;  %v1926_v30 = vld [vmem:[#allocation11 + $0x88] sm:$0xff]  }
 0x184   :  { %1738 = vmatpush3.bf16.msra.mxu0 %v1881_v22  ;;  %1759 = vmatprep.subr.bf16.mxu1 %v2121_v0 }
 0x185   :  { %1739 = vmatprep.subr.bf16.mxu0 %v2121_v0 }
 0x187   :  { %1760 = vmatpush3.bf16.msra.mxu1 %v1890_v45  ;;  %v1942_v45 = vld [vmem:[#allocation11 + $0x70] sm:$0xff]  }
 0x188   :  { %1740 = vmatpush3.bf16.msra.mxu0 %v1882_v23  ;;  %1765 = vmatprep.subr.bf16.mxu1 %v2121_v0 }
 0x189   :  { %1081 = vmatprep.subr.bf16.mxu0 %v1893_v47  ;;  %v1944_v47 = vld [vmem:[#allocation11 + $0xb8] sm:$0xff]  }
 0x23c   :  { %v669_v32 = vpop.f32.mrb[4].mxu1 }
 0x23d   :  { %v1723_v35 = vpop.f32.mrb[5].mxu1 }
 0x23e   :  { %v1612_v31 = vpop.f32.mrb[4].mxu0  ;;  %v672_v38 = vpop.f32.mrb[6].mxu1  ;;  %v1933_v35 = vld [vmem:[#allocation11 + $0x58] sm:$0xff]  }
 0x23f   :  { %v1613_v33 = vpop.f32.mrb[5].mxu0  ;;  %v1724_v40 = vpop.f32.mrb[7].mxu1  ;;  %v1936_v38 = vld [vmem:[#allocation11 + $0x60] sm:$0xff]  }
 0x240   :  { %v1614_v36 = vadd.f32 %v1613_v33, %v1612_v31  ;;  %v1615_v37 = vpop.f32.mrb[6].mxu0  ;;  %v1928_v31 = vld [vmem:[#allocation11 + $0x8] sm:$0xff]   ;;  %v1929_v33 = vld [vmem:[#allocation11 + $0x90] sm:$0xff]   ;;  %v1937_v40 = vld [vmem:[#allocation11 + $0x20] sm:$0xff]  }
 0x241   :  { %v1616_v39 = vpop.f32.mrb[7].mxu0  ;;  %v1934_v37 = vld [vmem:[#allocation11 + $0x18] sm:$0xff]  }
 0x242   :  { %v630_v41 = vadd.f32 %v1614_v36, %v1495_v34  ;;  %v1931_v34 = vld [vmem:[#allocation11 + $0x10] sm:$0xff]   ;;  %v1932_v36 = vld [vmem:[#allocation11 + $0x98] sm:$0xff]   ;;  %v1935_v39 = vld [vmem:[#allocation11 + $0xa0] sm:$0xff]  }
 0x244   :  { %v670_v42 = vadd.f32 %v669_v32, %v630_v41  ;;  %v1930_v32 = vld [vmem:[#allocation11 + $0x50] sm:$0xff]   ;;  %v1939_v41 = vld [vmem:[#allocation11 + $0x68] sm:$0xff]  }
 0x246   :  { %v675_v43 = vmax.f32 %v670_v42, 0.0  ;;  %v1938_v42 = vld [vmem:[#allocation11 + $0xa8] sm:$0xff]  }
 0x248   :  { %v676_v44 = vpack.c.bf16 %v675_v43, %v675_v43  ;;  %v1940_v43 = vld [vmem:[#allocation11 + $0x28] sm:$0xff]  }
 0x24a   :  { %1742 = vmatmul.mubr.bf16.vlgmr.msra.gmra.mrb[8].mxu0 %v676_v44  ;;  %v1941_v44 = vld [vmem:[#allocation11 + $0xb0] sm:$0xff]  }
 0x24b   :  { %1113 = vmatprep.mubr.bf16.mxu0 %v2122_v1  ;;  %1082 = vmatpush1.bf16.msra.mxu0 %v1891_v46  ;;  %v1909_v1 = vld [vmem:[#allocation10 + $0x64] ss:$12 sps:$4 sm:$0xff]  }
 0x24c   :  { %1083 = vmatprep.subr.bf16.mxu0 %v1897_v48  ;;  %v1943_v46 = vld [vmem:[#allocation11 + $0x30] sm:$0xff]   ;;  %v1945_v48 = vld [vmem:[#allocation11 + $0x78] sm:$0xff]  }
 0x24f   :  { %1084 = vmatpush1.bf16.msra.mxu0 %v1895_v49  ;;  %v1946_v49 = vld [vmem:[#allocation11 + $0x38] sm:$0xff]  }
 0x250   :  { %1085 = vmatprep.subr.bf16.mxu0 %v1901_v50  ;;  %v936_v50 = vld [vmem:[%s2415_s10] sm:$0x7] }
 0x253   :  { %1086 = vmatpush1.bf16.msra.mxu0 %v1899_v51  ;;  %v941_v51 = vrot.slane %v936_v50, %v168_v54 }
 0x254   :  { %1087 = vmatprep.subr.bf16.mxu0 %v1905_v52  ;;  %v949_v52 = vrot.slane %v936_v50, %v176_v57 }
 0x257   :  { %1088 = vmatpush1.bf16.msra.mxu0 %v1903_v55 }
 0x258   :  { %1089 = vmatprep.subr.bf16.mxu0 %v1909_v1 }
 0x25b   :  { %1090 = vmatpush1.bf16.msra.mxu0 %v1907_v58 }
 0x25c   :  { %1091 = vmatprep.subr.bf16.mxu0 %v1913_v59 }
 0x25f   :  { %1092 = vmatpush1.bf16.msra.mxu0 %v1911_v60 }
 0x260   :  { %1093 = vmatprep.subr.bf16.mxu0 %v1917_v61 }
 0x263   :  { %1094 = vmatpush1.bf16.msra.mxu0 %v1915_v62 }
 0x264   :  { %1095 = vmatprep.subr.bf16.mxu0 %v1921_v15 }
 0x267   :  { %1096 = vmatpush1.bf16.msra.mxu0 %v1919_v16 }
 0x268   :  { %1654 = vmatprep.subr.bf16.mxu0 %v1924_v18 }
 0x31d   :  { %v782_v2 = vpop.f32.mrb[8].mxu0 }
 0x31e   :  { %v783_v3 = vadd.f32 %v1520_v63, %v782_v2  ;;  %v1743_v4 = vpop.f32.mrb[9].mxu0 }
 0x31f   :  { %v785_v5 = vpop.f32.mrb[10].mxu0 }
 0x320   :  { %789 = vst.msk [vmem:[%s2418_s13] sm:$0xff] %vm788_vm1, %v783_v3  ;;  %v790_v7 = vpack.c.bf16 %v783_v3, %v783_v3  ;;  %v1744_v8 = vpop.f32.mrb[11].mxu0 }
 0x322   :  { %1762 = vmatmul.mubr.bf16.vlgmr.msra.gmra.mrb[8].mxu1 %v790_v7 }
 0x323   :  { %1766 = vmatpush3.bf16.msra.mxu1 %v1894_v6  ;;  %1781 = vmatprep.mubr.msk.bf16.mxu1 %vm2123_vm0, %v2121_v0 }
 0x324   :  { %1767 = vmatprep.subr.bf16.mxu1 %v2121_v0 }
 0x327   :  { %1768 = vmatpush3.bf16.msra.mxu1 %v1898_v9 }
 0x328   :  { %1769 = vmatprep.subr.bf16.mxu1 %v2121_v0 }
 0x32b   :  { %1770 = vmatpush3.bf16.msra.mxu1 %v1902_v10 }
 0x32c   :  { %1771 = vmatprep.subr.bf16.mxu1 %v2121_v0 }
 0x32f   :  { %1772 = vmatpush3.bf16.msra.mxu1 %v1906_v11  ;;  %v1562_v11 = vld [vmem:[%s2417_s12] ss:$0 sm:$0xff] }
 0x330   :  { %1773 = vmatprep.subr.bf16.mxu1 %v2121_v0 }
 0x333   :  { %1774 = vmatpush3.bf16.msra.mxu1 %v1910_v12 }
 0x334   :  { %1775 = vmatprep.subr.bf16.mxu1 %v2121_v0 }
 0x337   :  { %1776 = vmatpush3.bf16.msra.mxu1 %v1914_v13 }
 0x338   :  { %1777 = vmatprep.subr.bf16.mxu1 %v2121_v0 }
 0x33b   :  { %1778 = vmatpush3.bf16.msra.mxu1 %v1918_v14 }
 0x33c   :  { %1779 = vmatprep.subr.bf16.mxu1 %v2121_v0 }
 0x33f   :  { %1780 = vmatpush3.bf16.msra.mxu1 %v1922_v17 }
 0x340   :  { %1785 = vmatprep.subr.bf16.mxu1 %v2121_v0 }
 0x3f5   :  { %v896_v20 = vpop.f32.mrb[8].mxu1 }
 0x3f6   :  { %v897_v21 = vadd.f32 %v1529_v19, %v896_v20  ;;  %v1763_v22 = vpop.f32.mrb[9].mxu1 }
 0x3f7   :  { %v899_v23 = vpop.f32.mrb[10].mxu1 }
 0x3f8   :  { %v902_v24 = vmax.f32 %v897_v21, 0.0  ;;  %v1764_v25 = vpop.f32.mrb[11].mxu1 }
 0x3fa   :  { %v903_v28 = vpack.c.bf16 %v902_v24, %v902_v24 }
 0x3fc   :  { %1114 = vmatmul.mubr.bf16.vlgmr.msra.gmra.mrb[12].mxu0 %v903_v28  ;;  %1782 = vmatmul.mubr.bf16.vlgmr.msra.gmra.mrb[12].mxu1 %v903_v28 }
 0x3fd   :  { %1786 = vmatpush3.bf16.msra.mxu1 %v1923_v26  ;;  %1655 = vmatpush3.bf16.msra.mxu0 %v1925_v27 }
 0x3fe   :  { %1787 = vmatprep.subr.bf16.mxu1 %v2121_v0  ;;  %1656 = vmatprep.subr.bf16.mxu0 %v1927_v29 }
 0x3ff   :  { %1801 = vmatprep.mubr.msk.bf16.mxu1 %vm2123_vm0, %v2121_v0 }
 0x401   :  { %1788 = vmatpush3.bf16.msra.mxu1 %v1926_v30  ;;  %1657 = vmatpush3.bf16.msra.mxu0 %v1928_v31 }
 0x402   :  { %1789 = vmatprep.subr.bf16.mxu1 %v2121_v0  ;;  %1658 = vmatprep.subr.bf16.mxu0 %v1930_v32 }
 0x405   :  { %1790 = vmatpush3.bf16.msra.mxu1 %v1929_v33  ;;  %1659 = vmatpush3.bf16.msra.mxu0 %v1931_v34 }
 0x406   :  { %1791 = vmatprep.subr.bf16.mxu1 %v2121_v0  ;;  %1660 = vmatprep.subr.bf16.mxu0 %v1933_v35 }
 0x409   :  { %1792 = vmatpush3.bf16.msra.mxu1 %v1932_v36  ;;  %1661 = vmatpush3.bf16.msra.mxu0 %v1934_v37 }
 0x40a   :  { %1793 = vmatprep.subr.bf16.mxu1 %v2121_v0  ;;  %1662 = vmatprep.subr.bf16.mxu0 %v1936_v38 }
 0x40d   :  { %1794 = vmatpush3.bf16.msra.mxu1 %v1935_v39  ;;  %1663 = vmatpush3.bf16.msra.mxu0 %v1937_v40 }
 0x40e   :  { %1795 = vmatprep.subr.bf16.mxu1 %v2121_v0  ;;  %1664 = vmatprep.subr.bf16.mxu0 %v1939_v41 }
 0x411   :  { %1796 = vmatpush3.bf16.msra.mxu1 %v1938_v42  ;;  %1665 = vmatpush3.bf16.msra.mxu0 %v1940_v43 }
 0x412   :  { %1797 = vmatprep.subr.bf16.mxu1 %v2121_v0  ;;  %1666 = vmatprep.subr.bf16.mxu0 %v1942_v45 }
 0x415   :  { %1798 = vmatpush3.bf16.msra.mxu1 %v1941_v44  ;;  %1667 = vmatpush3.bf16.msra.mxu0 %v1943_v46 }
 0x416   :  { %1799 = vmatprep.subr.bf16.mxu1 %v2121_v0  ;;  %1668 = vmatprep.subr.bf16.mxu0 %v1945_v48  ;;  %v945_v0 = vrot.slane %v936_v50, %v172_v56 }
 0x419   :  { %1800 = vmatpush3.bf16.msra.mxu1 %v1944_v47  ;;  %1669 = vmatpush3.bf16.msra.mxu0 %v1946_v49 }
 0x4cf   :  { %v1115_v55 = vpop.f32.mrb[12].mxu0  ;;  %v1156_v1 = vpop.f32.mrb[12].mxu1 }
 0x4d0   :  { %v1116_v58 = vadd.f32 %v1115_v55, %v941_v51  ;;  %v1157_v59 = vadd.f32 %v1156_v1, %v949_v52  ;;  %v1117_v60 = vpop.f32.mrb[13].mxu0  ;;  %v1783_v61 = vpop.f32.mrb[13].mxu1 }
 0x4d1   :  { %v1118_v62 = vadd.f32 %v1117_v60, %v945_v0  ;;  %v1119_v63 = vpop.f32.mrb[14].mxu0  ;;  %v1159_v2 = vpop.f32.mrb[14].mxu1 }
 0x4d2   :  { %v1162_v3 = vmax.f32 %v1116_v58, 0.0  ;;  %v1164_v4 = vmax.f32 %v1157_v59, 0.0  ;;  %v1120_v5 = vpop.f32.mrb[15].mxu0  ;;  %v1784_v6 = vpop.f32.mrb[15].mxu1 }
 0x4d3   :  { %v1163_v54 = vmax.f32 %v1118_v62, 0.0 }
 0x4d4   :  { %v1167_v7 = vpack.c.bf16 %v1164_v4, %v1164_v4  ;;  %v1165_v57 = vpack.c.bf16 %v1162_v3, %v1162_v3 }
 0x4d5   :  { %v1166_v8 = vpack.c.bf16 %v1163_v54, %v1163_v54 }
 0x4d6   :  { %1802 = vmatmul.mubr.bf16.vlgmr.msra.gmra.mrb[16].mxu1 %v1167_v7 }
 0x4d7   :  { %1399 = vmatprep.mubr.bf16.mxu0 %v1166_v8 }
 0x4d8   :  { %1400 = vmatmul.mubr.bf16.vlgmr.msra.gmra.mrb[16].mxu0 %v1165_v57 }
 0x5a9   :  { %v1441_v53 = vpop.f32.mrb[16].mxu1 }
 0x5aa   :  { %v1803_v56 = vpop.f32.mrb[17].mxu1 }
 0x5ab   :  { %v1670_v9 = vpop.f32.mrb[16].mxu0  ;;  %v1444_v10 = vpop.f32.mrb[18].mxu1 }
 0x5ac   :  { %v1671_v12 = vpop.f32.mrb[17].mxu0  ;;  %v1804_v13 = vpop.f32.mrb[19].mxu1 }
 0x5ad   :  { %v1672_v14 = vadd.f32 %v1671_v12, %v1670_v9  ;;  %v1673_v15 = vpop.f32.mrb[18].mxu0 }
 0x5ae   :  { %v1674_v16 = vpop.f32.mrb[19].mxu0 }
 0x5af   :  { %v1402_v17 = vadd.f32 %v1672_v14, %v1562_v11 }
 0x5b1   :  { %v1442_v18 = vadd.f32 %v1441_v53, %v1402_v17 }
 0x5b3   :  { %1448 = vst.msk [vmem:[#allocation13] sm:$0xff] %vm1447_vm2, %v1442_v18 }
 0x5b4   :  { %2090 = shalt.err (!%p2087_p10)
}
 0x5b5   :  { %s2091_s15 = scalar_lea.hbm %s2419_s14, 128 }
 0x5b6   :  { %p2092_p11 = scmp.ne.s32.totalorder %s2419_s14, %s2091_s15  ;;  %p2095_p12 = scmp.lt.u32.totalorder %s2091_s15, %s2419_s14 }
 0x5b8   :  { %p2097_p13 = pnand %p2095_p12, %p2092_p11 }
 0x5ba   :  { %2100 = shalt.err (!%p2097_p13)
}
 0x5bb   :  { %1460 = dma.vmem_to_hbm [thread:$0]  %s1458_s19, 128, %s2419_s14, [#allocation4]  }
 0x5bc   :  { %2109 = dma.done.wait [#allocation4], 128  }
 0x5bd   :  { %2110 = vsyncadd [#allocation4], 4294967168 }
 0x5be   :  { %1466 = vsyncpa [#allocation3], 1 }
 0x5bf   :  { %1467 = vsyncpa [#allocation6], 1 }
 0x5c0   :  { %1468 = vsyncpa [#allocation9], 1 }
 0x5c1   :  { %1469 = vsyncpa [#allocation12], 1 }
 0x5c2   :  { %1470 = vsyncpa [#allocation4], 1 }

</bundles_post_ra>
